<compile_context>
chip_gen: v6e
topology: v6e:2x2x1
jax: 0.10.0
libtpu: 0.0.40
codegen_flags: <defaults>
</compile_context>

<pallas_src>
import functools

import jax
import jax.numpy as jnp
from jax.experimental import pallas as pl
from jax.experimental.pallas import tpu as pltpu


def mlp_kernel(xt_ref, w1t_ref, b1_ref, w2_ref, b2_ref, o_ref):
    # xt_ref : (in, TM)   current batch tile (batch on the lane axis), streamed
    # w1t_ref: (hid, in)  resident
    # b1_ref : (hid, 1)   resident
    # w2_ref : (hid, 1)   resident
    # b2_ref : (1,)       SMEM scalar
    # o_ref  : (1, TM)    lane-dense output row
    # Linear1 on the MXU with f32 accumulation.
    h = jnp.dot(w1t_ref[...], xt_ref[...], preferred_element_type=jnp.float32)
    h = jnp.maximum(h + b1_ref[...], 0.0)                       # ReLU (VPU)
    # Linear2 (N == 1): lane multiply + sublane reduction instead of an MXU
    # pass that would produce only one useful column.
    z = jnp.sum(h * w2_ref[...], axis=0, keepdims=True)          # (1, TM)
    z = z + b2_ref[0]                                            # SMEM scalar
    o_ref[...] = jax.nn.sigmoid(z).astype(o_ref.dtype)           # EUP


@functools.partial(jax.jit, static_argnames=("tm",))
def neural_net1_forward(x, w1, b1, w2, b2, *, tm=128):
    """x: [B, in]; w1: [in, hid]; b1: [hid]; w2: [hid, 1]; b2: [1] -> [B, 1]."""
    B, in_size = x.shape
    hid = w1.shape[1]
    n_tiles = pl.cdiv(B, tm)
    bp = n_tiles * tm

    # Lane-major (transposed) operands; pad batch up to a multiple of TM.
    xt = jnp.pad(x, ((0, bp - B), (0, 0))).T          # (in, Bp)
    w1t = w1.T                                        # (hid, in)
    b1c = b1.reshape(hid, 1)                          # (hid, 1)
    w2c = w2.reshape(hid, 1)                          # (hid, 1)
    b2s = b2.reshape(1)                               # (1,) SMEM scalar

    out = pl.pallas_call(
        mlp_kernel,
        out_shape=jax.ShapeDtypeStruct((1, bp), x.dtype),
        grid=(n_tiles,),
        in_specs=[
            pl.BlockSpec((in_size, tm), lambda i: (0, i)),    # x tile, streamed
            pl.BlockSpec((hid, in_size), lambda i: (0, 0)),   # w1^T, resident
            pl.BlockSpec((hid, 1), lambda i: (0, 0)),         # b1, resident
            pl.BlockSpec((hid, 1), lambda i: (0, 0)),         # w2, resident
            pl.BlockSpec(memory_space=pltpu.MemorySpace.SMEM),  # b2 scalar
        ],
        out_specs=pl.BlockSpec((1, tm), lambda i: (0, i)),    # lane-dense row
        compiler_params=pltpu.CompilerParams(
            dimension_semantics=("parallel",),
        ),
    )(xt, w1t, b1c, w2c, b2s)

    return out[0, :B].reshape(B, 1)


def init_params(key, input_size, hidden_size):
    # PyTorch nn.Linear default init: U(-1/sqrt(fan_in), 1/sqrt(fan_in)).
    k1, k2, k3, k4 = jax.random.split(key, 4)
    lim1 = 1.0 / jnp.sqrt(jnp.float32(input_size))
    lim2 = 1.0 / jnp.sqrt(jnp.float32(hidden_size))
    w1 = jax.random.uniform(k1, (input_size, hidden_size), jnp.float32, -lim1, lim1)
    b1 = jax.random.uniform(k2, (hidden_size,), jnp.float32, -lim1, lim1)
    w2 = jax.random.uniform(k3, (hidden_size, 1), jnp.float32, -lim2, lim2)
    b2 = jax.random.uniform(k4, (1,), jnp.float32, -lim2, lim2)
    return w1, b1, w2, b2


def reference_forward(x, w1, b1, w2, b2):
    h = jnp.maximum(x @ w1 + b1, 0.0)
    return jax.nn.sigmoid(h @ w2 + b2)


if __name__ == "__main__":
    input_size, hidden_size = 16, 32
    key = jax.random.PRNGKey(0)
    kx, kp = jax.random.split(key)
    w1, b1, w2, b2 = init_params(kp, input_size, hidden_size)

    # batch=8 exercises the padded single-tile path; batch=256 exercises
    # the multi-tile (grid=2, parallel batch axis) path.
    for batch in (8, 256):
        x = jax.random.normal(jax.random.fold_in(kx, batch),
                              (batch, input_size), jnp.float32)
        y = jax.block_until_ready(neural_net1_forward(x, w1, b1, w2, b2))
        y_ref = reference_forward(x, w1, b1, w2, b2)
        assert y.shape == (batch, 1)
        assert jnp.allclose(y, y_ref, atol=1e-5, rtol=1e-5)

    print("KERNEL_OK")
</pallas_src>

<mosaic_0001>
module attributes {stable_mosaic.version = 11 : i64} {
  func.func @mlp_kernel(%arg0: i32, %arg1: memref<16x128xf32, #tpu.memory_space<vmem>>, %arg2: memref<32x16xf32, #tpu.memory_space<vmem>>, %arg3: memref<32x1xf32, #tpu.memory_space<vmem>>, %arg4: memref<32x1xf32, #tpu.memory_space<vmem>>, %arg5: memref<1xf32, #tpu.memory_space<smem>>, %arg6: memref<1x128xf32, #tpu.memory_space<vmem>>) attributes {dimension_semantics = [#tpu.dimension_semantics<parallel>], iteration_bounds = array<i64: 1>, scalar_prefetch = 0 : i64, scratch_operands = 0 : i64, tpu.core_type = #tpu.core_type<tc>, window_params = [{transform_indices = @transform_0, window_bounds = array<i64: 16, 128>}, {pipeline_mode = #tpu.pipeline_mode<synchronous>, transform_indices = @transform_1, window_bounds = array<i64: 32, 16>}, {pipeline_mode = #tpu.pipeline_mode<synchronous>, transform_indices = @transform_2, window_bounds = array<i64: 32, 1>}, {pipeline_mode = #tpu.pipeline_mode<synchronous>, transform_indices = @transform_3, window_bounds = array<i64: 32, 1>}, {transform_indices = @transform_4, window_bounds = array<i64: 1>}, {transform_indices = @transform_5, window_bounds = array<i64: 1, 128>}]} {
    %c0 = arith.constant 0 : index
    %c0_0 = arith.constant 0 : index
    %0 = vector.load %arg2[%c0, %c0_0] : memref<32x16xf32, #tpu.memory_space<vmem>>, vector<32x16xf32>
    %c0_1 = arith.constant 0 : index
    %c0_2 = arith.constant 0 : index
    %1 = vector.load %arg1[%c0_1, %c0_2] : memref<16x128xf32, #tpu.memory_space<vmem>>, vector<16x128xf32>
    %cst = arith.constant dense<0.000000e+00> : vector<32x128xf32>
    %2 = tpu.matmul %0, %1, %cst {dimension_numbers = #tpu.dot_dimension_numbers<[1], [0], [0], [1], [0, 0, 1, 1], [], []>} : vector<32x16xf32>, vector<16x128xf32>, vector<32x128xf32> -> vector<32x128xf32>
    %c0_3 = arith.constant 0 : index
    %c0_4 = arith.constant 0 : index
    %3 = vector.load %arg3[%c0_3, %c0_4] : memref<32x1xf32, #tpu.memory_space<vmem>>, vector<32x1xf32>
    %4 = vector.broadcast %3 : vector<32x1xf32> to vector<32x128xf32>
    %5 = arith.addf %2, %4 : vector<32x128xf32>
    %cst_5 = arith.constant 0.000000e+00 : f32
    %6 = vector.broadcast %cst_5 : f32 to vector<32x128xf32>
    %7 = arith.maximumf %5, %6 : vector<32x128xf32>
    %c0_6 = arith.constant 0 : index
    %c0_7 = arith.constant 0 : index
    %8 = vector.load %arg4[%c0_6, %c0_7] : memref<32x1xf32, #tpu.memory_space<vmem>>, vector<32x1xf32>
    %9 = vector.broadcast %8 : vector<32x1xf32> to vector<32x128xf32>
    %10 = arith.mulf %7, %9 : vector<32x128xf32>
    %cst_8 = arith.constant dense<0.000000e+00> : vector<128xf32>
    %11 = vector.multi_reduction <add>, %10, %cst_8 [0] : vector<32x128xf32> to vector<128xf32>
    %12 = vector.shape_cast %11 : vector<128xf32> to vector<1x128xf32>
    %c0_9 = arith.constant 0 : index
    %13 = memref.load %arg5[%c0_9] : memref<1xf32, #tpu.memory_space<smem>>
    %14 = vector.broadcast %13 : f32 to vector<1x128xf32>
    %15 = arith.addf %12, %14 : vector<1x128xf32>
    %16 = arith.negf %15 : vector<1x128xf32>
    %17 = math.exp %16 : vector<1x128xf32>
    %cst_10 = arith.constant 1.000000e+00 : f32
    %18 = vector.broadcast %cst_10 : f32 to vector<1x128xf32>
    %19 = arith.addf %18, %17 : vector<1x128xf32>
    %20 = arith.divf %18, %19 : vector<1x128xf32>
    %c0_11 = arith.constant 0 : index
    %c0_12 = arith.constant 0 : index
    %21 = vector.load %arg6[%c0_11, %c0_12] : memref<1x128xf32, #tpu.memory_space<vmem>>, vector<1x128xf32>
    tpu.vector_store %arg6[%c0_11, %c0_12], %20 {strides = array<i32>} : memref<1x128xf32, #tpu.memory_space<vmem>>, vector<1x128xf32>,
    return
  }
  func.func @transform_0(%arg0: i32) -> (i32, i32) {
    %c0_i32 = arith.constant 0 : i32
    %c0_i32_0 = arith.constant 0 : i32
    return %c0_i32, %arg0 : i32, i32
  }
  func.func @transform_1(%arg0: i32) -> (i32, i32) {
    %c0_i32 = arith.constant 0 : i32
    %c0_i32_0 = arith.constant 0 : i32
    %c0_i32_1 = arith.constant 0 : i32
    return %c0_i32, %c0_i32_0 : i32, i32
  }
  func.func @transform_2(%arg0: i32) -> (i32, i32) {
    %c0_i32 = arith.constant 0 : i32
    %c0_i32_0 = arith.constant 0 : i32
    %c0_i32_1 = arith.constant 0 : i32
    return %c0_i32, %c0_i32_0 : i32, i32
  }
  func.func @transform_3(%arg0: i32) -> (i32, i32) {
    %c0_i32 = arith.constant 0 : i32
    %c0_i32_0 = arith.constant 0 : i32
    %c0_i32_1 = arith.constant 0 : i32
    return %c0_i32, %c0_i32_0 : i32, i32
  }
  func.func @transform_4(%arg0: i32) -> i32 {
    %c0_i32 = arith.constant 0 : i32
    %c0_i32_0 = arith.constant 0 : i32
    return %c0_i32 : i32
  }
  func.func @transform_5(%arg0: i32) -> (i32, i32) {
    %c0_i32 = arith.constant 0 : i32
    %c0_i32_0 = arith.constant 0 : i32
    return %c0_i32, %arg0 : i32, i32
  }
}

</mosaic_0001>

<bundles_post_ra>
// kernel: neural_net1_forward.1
= control target key start
LH: loop header
LB: loop body
LE: loop exit
PB: predicated region body
PF: predicated region fallthrough
CT: control target
= control target key end

     0   :  { %v236_v2 = vmov 0   ;;  %vm51_vm0 = vcmask 130048   ;;  %s315_s0 = inlined_call_operand.vmem [shape: f32[16,128], index: 0, kind: input, shape index: {}]   ;;  %s316_s1 = inlined_call_operand.vmem [shape: f32[32,16], index: 1, kind: input, shape index: {}]   ;;  %s317_s2 = inlined_call_operand.vmem [shape: f32[32,1], index: 2, kind: input, shape index: {}]   ;;  %s318_s3 = inlined_call_operand.vmem [shape: f32[32,1], index: 3, kind: input, shape index: {}]   ;;  %s319_s4 = inlined_call_operand.<no memory space> [shape: f32[1], index: 4, kind: input, shape index: {}]   ;;  %s320_s5 = inlined_call_operand.vmem [shape: f32[1,128], index: 5, kind: output, shape index: {}]  }
   0x1   :  { %v26_v0 = vld [vmem:[%s315_s0 + $0x8] sm:$0xff]  ;;  %v25_v1 = vld [vmem:[%s315_s0] sm:$0xff]  ;;  %230 = vset.pattern.permute.xlu0 %v236_v2  ;;  %231 = vset.pattern.permute.xlu1 %v236_v2  ;;  %v23_v4 = vld [vmem:[%s316_s1 + $0x10] sm:$0xff]  ;;  %v191_v47 = vstv %s319_s4 }
   0x2   :  { %215 = vmatprep.subr.mxu0 %v26_v0  ;;  %225 = vmatprep.subr.mxu1 %v26_v0  ;;  %v21_v3 = vld [vmem:[%s316_s1] sm:$0xff]  ;;  %v22_v5 = vld [vmem:[%s316_s1 + $0x8] sm:$0xff]  ;;  %v24_v6 = vld [vmem:[%s316_s1 + $0x18] sm:$0xff] }
   0x3   :  { %216 = vmatpush3.msra.mxu0 %v26_v0  ;;  %227 = vmatpush3.msra.mxu1 %v26_v0  ;;  %v27_v7 = vld [vmem:[%s317_s2] sm:$0xff]  ;;  %v29_v8 = vld [vmem:[%s317_s2 + $0x10] sm:$0xff]  ;;  %v28_v9 = vld [vmem:[%s317_s2 + $0x8] sm:$0xff] }
   0x4   :  { %217 = vmatprep.subr.mxu0 %v25_v1  ;;  %226 = vmatprep.subr.mxu1 %v25_v1  ;;  %v30_v10 = vld [vmem:[%s317_s2 + $0x18] sm:$0xff]  ;;  %v153_v11 = vld [vmem:[%s318_s3] sm:$0xff]  ;;  %v154_v12 = vld [vmem:[%s318_s3 + $0x8] sm:$0xff] }
   0x5   :  { %218 = vmatpush3.msra.mxu0 %v25_v1  ;;  %228 = vmatpush3.msra.mxu1 %v25_v1  ;;  %v155_v13 = vld [vmem:[%s318_s3 + $0x10] sm:$0xff]  ;;  %v156_v14 = vld [vmem:[%s318_s3 + $0x18] sm:$0xff] }
   0x6   :  { %219 = vmatprep.mubr.msk.f32.mxu0 %vm51_vm0, %v21_v3  ;;  %222 = vmatprep.mubr.msk.f32.mxu1 %vm51_vm0, %v23_v4 }
   0x7   :  { %220 = vmatmul.mubr.msk.f32.vlgmr.msra.gmra.mxu0 %vm51_vm0, %v22_v5  ;;  %223 = vmatmul.mubr.msk.f32.vlgmr.msra.gmra.mxu1 %vm51_vm0, %v24_v6 }
   0x8   :  { %33 = vperm.xlu0 %230, %v27_v7   ;;  %43 = vperm.xlu1 %231, %v29_v8  }
   0xc   :  { %38 = vperm.xlu0 %230, %v28_v9   ;;  %48 = vperm.xlu1 %231, %v30_v10  }
  0x10   :  { %159 = vperm.xlu0 %230, %v153_v11   ;;  %164 = vperm.xlu1 %231, %v154_v12  }
  0x14   :  { %169 = vperm.xlu0 %230, %v155_v13   ;;  %174 = vperm.xlu1 %231, %v156_v14  }
  0x83   :  { %v34_v15 = vpop.permute.xlu0 %33  ;;  %v44_v16 = vpop.permute.xlu1 %43 }
  0x87   :  { %v39_v17 = vpop.permute.xlu0 %38  ;;  %v49_v18 = vpop.permute.xlu1 %48 }
  0x8b   :  { %v160_v21 = vpop.permute.xlu0 %159  ;;  %v165_v29 = vpop.permute.xlu1 %164 }
  0x8f   :  { %v170_v35 = vpop.permute.xlu0 %169  ;;  %v175_v38 = vpop.permute.xlu1 %174 }
  0xc7   :  { %v221_v19 = vpop.f32.mrf.mxu0  ;;  %v224_v20 = vpop.f32.mrf.mxu1 }
  0xc8   :  { %v136_v22 = vadd.f32 %v221_v19, %v39_v17  ;;  %v146_v26 = vadd.f32 %v224_v20, %v49_v18 }
  0xc9   :  { %v130_v23 = vpop.f32.mrf.mxu0  ;;  %v140_v24 = vpop.f32.mrf.mxu1 }
  0xca   :  { %v150_v25 = vmax.f32 %v136_v22, 0.0  ;;  %v131_v27 = vadd.f32 %v130_v23, %v34_v15  ;;  %v141_v28 = vadd.f32 %v140_v24, %v44_v16  ;;  %v152_v33 = vmax.f32 %v146_v26, 0.0 }
  0xcc   :  { %v149_v30 = vmax.f32 %v131_v27, 0.0  ;;  %v151_v31 = vmax.f32 %v141_v28, 0.0  ;;  %v178_v32 = vmul.f32 %v165_v29, %v150_v25  ;;  %v180_v39 = vmul.f32 %v175_v38, %v152_v33 }
  0xce   :  { %v177_v34 = vmul.f32 %v160_v21, %v149_v30  ;;  %v179_v37 = vmul.f32 %v170_v35, %v151_v31 }
  0xd0   :  { %v181_v36 = vadd.f32 %v178_v32, %v177_v34 }
  0xd2   :  { %v182_v40 = vadd.f32 %v181_v36, %v179_v37 }
  0xd4   :  { %v183_v41 = vadd.f32 %v182_v40, %v180_v39 }
  0xd6   :  { %v184_v42 = vrot.slane %v183_v41, 4 }
  0xd8   :  { %v185_v43 = vadd.f32 %v184_v42, %v183_v41 }
  0xda   :  { %v186_v44 = vrot.slane %v185_v43, 2 }
  0xdc   :  { %v187_v45 = vadd.f32 %v186_v44, %v185_v43 }
  0xde   :  { %v188_v46 = vrot.slane %v187_v45, 1 }
  0xe0   :  { %v189_v48 = vadd.f32 %v188_v46, %v187_v45 }
  0xe2   :  { %v192_v49 = vadd.f32 %v191_v47, %v189_v48 }
  0xe4   :  { %v208_v50 = vmul.f32 -1.442695, %v192_v49 }
  0xe6   :  { %232 = vpow2.f32 %v208_v50 }
  0xf3   :  { %v233_v51 = vpop.eup %232 }
  0xf4   :  { %v196_v52 = vadd.f32 1.0, %v233_v51 }
  0xf6   :  { %234 = vrcp.f32 %v196_v52 }
 0x103   :  { %v235_v53 = vpop.eup %234 }
 0x104   :  { %199 = vst [vmem:[%s320_s5] sm:$0x1] %v235_v53 }

</bundles_post_ra>
